<compile_context>
chip_gen: v7x
topology: tpu7x:2x2x1
jax: 0.10.0
libtpu: 0.0.40
codegen_flags: <defaults>
</compile_context>

<pallas_src>
import jax
import jax.numpy as jnp
from jax.experimental import pallas as pl
from jax.experimental.pallas import tpu as pltpu


def _round_up(x, m):
    return (x + m - 1) // m * m


def _cond_embed_kernel(units_ref, fv_ref, cond_ref, wu_ref, wfv_ref, out_ref):
    # units_ref: [1, tT, n_unit] bf16      fv_ref:  [1, tT, 2]  f32
    # cond_ref:  [1, 1, Hp]      f32       wu_ref:  [n_unit, Hp] bf16
    # wfv_ref:   [2, Hp]         f32       out_ref: [1, tT, Hp]  f32
    # unit_embed: bf16 x bf16 matmul on the MXU with f32 accumulation.
    x = jnp.dot(units_ref[0], wu_ref[...], preferred_element_type=jnp.float32)
    fv = fv_ref[0]                                   # [tT, 2] = [log1p(f0/700), volume]
    x = x + fv[:, 0:1] * wfv_ref[0:1, :]             # f0_embed weight
    x = x + fv[:, 1:2] * wfv_ref[1:2, :]             # volume_embed weight
    x = x + cond_ref[0]                              # folded biases + aug + speaker
    out_ref[0] = x.astype(out_ref.dtype)


def unit2mel_cond_embed(units, f0, volume, spk_vec, aug_shift, params):
    """Fused Unit2Mel conditioning embedding.

    units:     [B, T, n_unit] float32
    f0:        [B, T, 1]      float32
    volume:    [B, T, 1]      float32
    spk_vec:   [B, 1, H]      float32  (already-gathered spk_embed(spk_id - 1))
    aug_shift: [B, 1, 1]      float32
    returns:   [B, T, H]      float32
    """
    B, T, n_unit = units.shape
    H = params["unit_w"].shape[1]
    Hp = _round_up(H, 128)                      # lane-dense output stores

    # --- T tiling (multiple of 8; ~512 rows keeps VMEM small even on v7x) ---
    if T <= 512:
        tT = _round_up(T, 8)
        Tp = tT
    else:
        tT = 512
        Tp = _round_up(T, tT)

    # --- wrapper-side folding / packing (all tiny, layout plumbing) ---------
    # packed f0/volume channel: [B, T, 2]
    fv = jnp.concatenate([jnp.log1p(f0 / 700.0), volume], axis=-1).astype(jnp.float32)
    # per-batch constant: biases + aug-shift embed + speaker embed  -> [B, 1, H]
    cond_b = (params["unit_b"] + params["f0_b"] + params["vol_b"]
              + (aug_shift / 5.0) * params["aug_w"] + spk_vec).astype(jnp.float32)
    # bf16 matmul operands (f32 accumulation requested inside the kernel)
    units_bf = units.astype(jnp.bfloat16)
    wu_bf = params["unit_w"].astype(jnp.bfloat16)
    # f0/volume weights stacked: [2, H]
    wfv = jnp.concatenate([params["f0_w"], params["vol_w"]], axis=0).astype(jnp.float32)

    # --- padding to tile-friendly shapes ------------------------------------
    if Tp != T:
        units_bf = jnp.pad(units_bf, ((0, 0), (0, Tp - T), (0, 0)))
        fv = jnp.pad(fv, ((0, 0), (0, Tp - T), (0, 0)))
    if Hp != H:
        wu_bf = jnp.pad(wu_bf, ((0, 0), (0, Hp - H)))
        wfv = jnp.pad(wfv, ((0, 0), (0, Hp - H)))
        cond_b = jnp.pad(cond_b, ((0, 0), (0, 0), (0, Hp - H)))

    grid = (B, Tp // tT)
    shared = lambda b, t: (0, 0)                # weights: same block every step

    out = pl.pallas_call(
        _cond_embed_kernel,
        out_shape=jax.ShapeDtypeStruct((B, Tp, Hp), jnp.float32),
        grid_spec=pltpu.PrefetchScalarGridSpec(
            num_scalar_prefetch=0,
            grid=grid,
            in_specs=[
                pl.BlockSpec((1, tT, n_unit), lambda b, t: (b, t, 0)),   # units (bf16)
                pl.BlockSpec((1, tT, 2), lambda b, t: (b, t, 0)),        # [log1p(f0/700), volume]
                pl.BlockSpec((1, 1, Hp), lambda b, t: (b, 0, 0)),        # folded per-batch const
                pl.BlockSpec((n_unit, Hp), shared),                      # unit_w (bf16)
                pl.BlockSpec((2, Hp), shared),                           # [f0_w; vol_w]
            ],
            out_specs=pl.BlockSpec((1, tT, Hp), lambda b, t: (b, t, 0)),
        ),
        compiler_params=pltpu.CompilerParams(
            dimension_semantics=("parallel", "parallel"),
            vmem_limit_bytes=64 * 1024 * 1024,
        ),
    )(units_bf, fv, cond_b, wu_bf, wfv)

    return out[:, :T, :H]


def _reference(units, f0, volume, spk_vec, aug_shift, params):
    # Same math, same bf16 matmul precision as the kernel.
    x = jnp.dot(units.astype(jnp.bfloat16), params["unit_w"].astype(jnp.bfloat16),
                preferred_element_type=jnp.float32)
    x = x + params["unit_b"]
    x = x + jnp.log1p(f0 / 700.0) * params["f0_w"] + params["f0_b"]
    x = x + volume * params["vol_w"] + params["vol_b"]
    x = x + (aug_shift / 5.0) * params["aug_w"]
    x = x + spk_vec
    return x


if __name__ == "__main__":
    # Small synthetic configuration (consistent with Unit2Mel.__init__ shapes).
    B, T = 2, 16
    input_channel = 8       # n_unit
    n_hidden = 32
    n_spk = 4

    key = jax.random.PRNGKey(0)
    ks = jax.random.split(key, 12)

    # PyTorch Linear weight [out, in] stored transposed as [in, out].
    params = {
        "unit_w": jax.random.normal(ks[0], (input_channel, n_hidden), jnp.float32) * 0.1,
        "unit_b": jax.random.normal(ks[1], (1, n_hidden), jnp.float32) * 0.1,
        "f0_w":   jax.random.normal(ks[2], (1, n_hidden), jnp.float32) * 0.1,
        "f0_b":   jax.random.normal(ks[3], (1, n_hidden), jnp.float32) * 0.1,
        "vol_w":  jax.random.normal(ks[4], (1, n_hidden), jnp.float32) * 0.1,
        "vol_b":  jax.random.normal(ks[5], (1, n_hidden), jnp.float32) * 0.1,
        "aug_w":  jax.random.normal(ks[6], (1, n_hidden), jnp.float32) * 0.1,
    }
    spk_table = jax.random.normal(ks[7], (n_spk, n_hidden), jnp.float32) * 0.1

    # Inputs.
    units = jax.random.normal(ks[8], (B, T, input_channel), jnp.float32)
    f0 = jnp.abs(jax.random.normal(ks[9], (B, T, 1), jnp.float32)) * 200.0 + 50.0
    volume = jnp.abs(jax.random.normal(ks[10], (B, T, 1), jnp.float32))
    aug_shift = jax.random.normal(ks[11], (B, 1, 1), jnp.float32)
    spk_id = jnp.array([[1], [3]], dtype=jnp.int32)            # values in [1, n_spk]

    # Speaker-embedding gather (spk_embed(spk_id - 1)) stays in plain JAX.
    spk_vec = spk_table[(spk_id - 1)[:, 0]][:, None, :]        # [B, 1, H]

    out = unit2mel_cond_embed(units, f0, volume, spk_vec, aug_shift, params)
    out = jax.block_until_ready(out)

    ref = _reference(units, f0, volume, spk_vec, aug_shift, params)
    assert out.shape == (B, T, n_hidden)
    assert jnp.allclose(out, ref, atol=1e-3, rtol=1e-3), "mismatch vs reference"

    print("KERNEL_OK")
</pallas_src>

<mosaic_0001>
module attributes {stable_mosaic.version = 11 : i64} {
  func.func @_cond_embed_kernel(%arg0: i32, %arg1: i32, %arg2: memref<1x16x8xbf16, #tpu.memory_space<vmem>>, %arg3: memref<1x16x2xf32, #tpu.memory_space<vmem>>, %arg4: memref<1x1x128xf32, #tpu.memory_space<vmem>>, %arg5: memref<8x128xbf16, #tpu.memory_space<vmem>>, %arg6: memref<2x128xf32, #tpu.memory_space<vmem>>, %arg7: memref<1x16x128xf32, #tpu.memory_space<vmem>>) attributes {dimension_semantics = [#tpu.dimension_semantics<parallel>, #tpu.dimension_semantics<parallel>], iteration_bounds = array<i64: 2, 1>, scalar_prefetch = 0 : i64, scratch_operands = 0 : i64, tpu.core_type = #tpu.core_type<tc>, window_params = [{transform_indices = @transform_0, window_bounds = array<i64: 1, 16, 8>}, {transform_indices = @transform_1, window_bounds = array<i64: 1, 16, 2>}, {transform_indices = @transform_2, window_bounds = array<i64: 1, 1, 128>}, {pipeline_mode = #tpu.pipeline_mode<synchronous>, transform_indices = @transform_3, window_bounds = array<i64: 8, 128>}, {pipeline_mode = #tpu.pipeline_mode<synchronous>, transform_indices = @transform_4, window_bounds = array<i64: 2, 128>}, {transform_indices = @transform_5, window_bounds = array<i64: 1, 16, 128>}]} {
    %c0 = arith.constant 0 : index
    %c0_0 = arith.constant 0 : index
    %c0_1 = arith.constant 0 : index
    %0 = vector.load %arg2[%c0, %c0_0, %c0_1] : memref<1x16x8xbf16, #tpu.memory_space<vmem>>, vector<1x16x8xbf16>
    %1 = vector.shape_cast %0 : vector<1x16x8xbf16> to vector<16x8xbf16>
    %c0_2 = arith.constant 0 : index
    %c0_3 = arith.constant 0 : index
    %2 = vector.load %arg5[%c0_2, %c0_3] : memref<8x128xbf16, #tpu.memory_space<vmem>>, vector<8x128xbf16>
    %cst = arith.constant dense<0.000000e+00> : vector<16x128xf32>
    %3 = tpu.matmul %1, %2, %cst {dimension_numbers = #tpu.dot_dimension_numbers<[1], [0], [0], [1], [0, 0, 1, 1], [], []>} : vector<16x8xbf16>, vector<8x128xbf16>, vector<16x128xf32> -> vector<16x128xf32>
    %c0_4 = arith.constant 0 : index
    %c0_5 = arith.constant 0 : index
    %c0_6 = arith.constant 0 : index
    %4 = vector.load %arg3[%c0_4, %c0_5, %c0_6] : memref<1x16x2xf32, #tpu.memory_space<vmem>>, vector<1x16x2xf32>
    %5 = vector.shape_cast %4 : vector<1x16x2xf32> to vector<16x2xf32>
    %6 = vector.extract_strided_slice %5 {offsets = [0, 0], sizes = [16, 1], strides = [1, 1]} : vector<16x2xf32> to vector<16x1xf32>
    %c0_7 = arith.constant 0 : index
    %c0_8 = arith.constant 0 : index
    %7 = vector.load %arg6[%c0_7, %c0_8] : memref<2x128xf32, #tpu.memory_space<vmem>>, vector<1x128xf32>
    %8 = vector.broadcast %6 : vector<16x1xf32> to vector<16x128xf32>
    %9 = vector.broadcast %7 : vector<1x128xf32> to vector<16x128xf32>
    %10 = arith.mulf %8, %9 : vector<16x128xf32>
    %11 = arith.addf %3, %10 : vector<16x128xf32>
    %12 = vector.extract_strided_slice %5 {offsets = [0, 1], sizes = [16, 1], strides = [1, 1]} : vector<16x2xf32> to vector<16x1xf32>
    %c1 = arith.constant 1 : index
    %c0_9 = arith.constant 0 : index
    %13 = vector.load %arg6[%c1, %c0_9] : memref<2x128xf32, #tpu.memory_space<vmem>>, vector<1x128xf32>
    %14 = vector.broadcast %12 : vector<16x1xf32> to vector<16x128xf32>
    %15 = vector.broadcast %13 : vector<1x128xf32> to vector<16x128xf32>
    %16 = arith.mulf %14, %15 : vector<16x128xf32>
    %17 = arith.addf %11, %16 : vector<16x128xf32>
    %c0_10 = arith.constant 0 : index
    %c0_11 = arith.constant 0 : index
    %c0_12 = arith.constant 0 : index
    %18 = vector.load %arg4[%c0_10, %c0_11, %c0_12] : memref<1x1x128xf32, #tpu.memory_space<vmem>>, vector<1x1x128xf32>
    %19 = vector.shape_cast %18 : vector<1x1x128xf32> to vector<1x128xf32>
    %20 = vector.broadcast %19 : vector<1x128xf32> to vector<16x128xf32>
    %21 = arith.addf %17, %20 : vector<16x128xf32>
    %c0_13 = arith.constant 0 : index
    %c0_14 = arith.constant 0 : index
    %c0_15 = arith.constant 0 : index
    %22 = vector.load %arg7[%c0_13, %c0_14, %c0_15] : memref<1x16x128xf32, #tpu.memory_space<vmem>>, vector<1x16x128xf32>
    %23 = vector.shape_cast %22 : vector<1x16x128xf32> to vector<16x128xf32>
    %24 = vector.shape_cast %21 : vector<16x128xf32> to vector<1x16x128xf32>
    tpu.vector_store %arg7[%c0_13, %c0_14, %c0_15], %24 {strides = array<i32>} : memref<1x16x128xf32, #tpu.memory_space<vmem>>, vector<1x16x128xf32>,
    return
  }
  func.func @transform_0(%arg0: i32, %arg1: i32) -> (i32, i32, i32) {
    %c0_i32 = arith.constant 0 : i32
    %c0_i32_0 = arith.constant 0 : i32
    return %arg0, %arg1, %c0_i32 : i32, i32, i32
  }
  func.func @transform_1(%arg0: i32, %arg1: i32) -> (i32, i32, i32) {
    %c0_i32 = arith.constant 0 : i32
    %c0_i32_0 = arith.constant 0 : i32
    return %arg0, %arg1, %c0_i32 : i32, i32, i32
  }
  func.func @transform_2(%arg0: i32, %arg1: i32) -> (i32, i32, i32) {
    %c0_i32 = arith.constant 0 : i32
    %c0_i32_0 = arith.constant 0 : i32
    %c0_i32_1 = arith.constant 0 : i32
    return %arg0, %c0_i32, %c0_i32_0 : i32, i32, i32
  }
  func.func @transform_3(%arg0: i32, %arg1: i32) -> (i32, i32) {
    %c0_i32 = arith.constant 0 : i32
    %c0_i32_0 = arith.constant 0 : i32
    %c0_i32_1 = arith.constant 0 : i32
    return %c0_i32, %c0_i32_0 : i32, i32
  }
  func.func @transform_4(%arg0: i32, %arg1: i32) -> (i32, i32) {
    %c0_i32 = arith.constant 0 : i32
    %c0_i32_0 = arith.constant 0 : i32
    %c0_i32_1 = arith.constant 0 : i32
    return %c0_i32, %c0_i32_0 : i32, i32
  }
  func.func @transform_5(%arg0: i32, %arg1: i32) -> (i32, i32, i32) {
    %c0_i32 = arith.constant 0 : i32
    %c0_i32_0 = arith.constant 0 : i32
    return %arg0, %arg1, %c0_i32 : i32, i32, i32
  }
}

</mosaic_0001>

<bundles_post_ra>
// kernel: tpu_custom_call.1
= control target key start
LH: loop header
LB: loop body
LE: loop exit
PB: predicated region body
PF: predicated region fallthrough
CT: control target
= control target key end

     0   :  { %s1389_s0 = inlined_call_operand.hbm [shape: bf16[2,16,8], index: 0, kind: input, shape index: {}]   ;;  %s1390_s1 = inlined_call_operand.hbm [shape: f32[2,16,2], index: 1, kind: input, shape index: {}]   ;;  %s1391_s2 = inlined_call_operand.hbm [shape: f32[2,1,128], index: 2, kind: input, shape index: {}]   ;;  %s1392_s3 = inlined_call_operand.hbm [shape: bf16[8,128], index: 3, kind: input, shape index: {}]   ;;  %s1393_s4 = inlined_call_operand.hbm [shape: f32[2,128], index: 4, kind: input, shape index: {}]   ;;  %s1394_s5 = inlined_call_operand.hbm [shape: f32[2,16,128], index: 5, kind: output, shape index: {}]  }
   0x1   :  { %1410 = sst [smem:[#allocation20_spill]] %s1390_s1 }
   0x2   :  { %1411 = sst [smem:[#allocation21_spill]] %s1392_s3 }
   0x3   :  { %1412 = sst [smem:[#allocation22_spill]] %s1394_s5 }
   0x4   :  { %10 = vsyncpa [#allocation3], 0 }
   0x5   :  { %12 = vsyncpa [#allocation3 + $0x1], 0 }
   0x6   :  { %13 = vsyncpa [#allocation6], 0 }
   0x7   :  { %15 = vsyncpa [#allocation6 + $0x1], 0 }
   0x8   :  { %16 = vsyncpa [#allocation9], 0 }
   0x9   :  { %17 = vsyncpa [#allocation4], 0 }
   0xa   :  { %19 = vsyncpa [#allocation4 + $0x1], 0  ;;  %s1065_s18 = smov 0   ;;  %s1067_s19 = smov 0  }
   0xb   :  { %s1069_s20 = smov 0   ;;  %s1071_s21 = smov 0  }
   0xc   :  { %s1073_s22 = smov 0   ;;  %s1075_s23 = smov 0  }
   0xd LB: > { %1413 = sst [smem:[#allocation16_spill]] %s997_s18  ;;  %s1096_s24 = sadd.s32 4294967295, %s1017_s23   ;;  %s1017_s23 = sphi %s1075_s23, %s25_s23   ;;  %s1013_s22 = sphi %s1073_s22, %s1453_s22   ;;  %s1009_s21 = sphi %s1071_s21, %s1452_s21   ;;  %s1005_s20 = sphi %s1069_s20, %s1451_s20   ;;  %s1001_s19 = sphi %s1067_s19, %s1450_s19   ;;  %s997_s18 = sphi %s1065_s18, %s1449_s18  }
   0xe   : > { %s635_s25 = sadd.s32 4294967294, %s1017_s23   ;;  %p53_p0 = scmp.ne.s32.totalorder %s1005_s20, %s1001_s19 }
   0xf   : > { %p54_p1 = scmp.eq.s32.totalorder %s1017_s23, 0  ;;  %p59_p2 = scmp.ne.s32.totalorder %s1001_s19, %s997_s18 }
  0x10   : > { %p1395_p3 = scmp.eq.s32.totalorder %s1096_s24, 0  ;;  %p181_p4 = scmp.eq.s32.totalorder %s1096_s24, 1 }
  0x11   : > { %p1107_p5 = por %p54_p1, %p53_p0  ;;  %p187_p6 = scmp.eq.s32.totalorder %s635_s25, 1 }
  0x12   : > { %p1113_p7 = por %p1395_p3, %p59_p2  ;;  %p1117_p8 = por %p181_p4, %p53_p0 }
  0x13   : > { %p1121_p9 = por %p187_p6, %p59_p2  ;;  %p636_p10 = scmp.ge.s32.totalorder %s1017_s23, 1 }
  0x14   : > { %s1415_s28 = scalar_select %p1113_p7, 1, 0 }
  0x15   : > { %s1416_s29 = scalar_select %p1117_p8, 1, 0 }
  0x16   : > { %s1417_s30 = scalar_select %p1121_p9, 1, 0 }
  0x17   : > { %p194_p11 = scmp.lt.s32.totalorder %s1017_s23, 3  ;;  %s1019_s7 = smov [#allocation8]  }
  0x18   : > { %1418 = sst [smem:[#allocation17_spill]] %s1417_s30  ;;  %s207_s8 = sshll.u32 %s1019_s7, 4  ;;  %s208_s8 = int_to_ptr.vmem [resolvable:$true] %s207_s8 }
  0x19   : > { %p1128_p13 = pnand %p636_p10, %p194_p11  ;;  %p713_p1 = scmp.lt.s32.totalorder %s1017_s23, 2 }
  0x1a   : > { %s37_s11 = sadd.s32 1, %s1013_s22  ;;  %s1153_s13 = sand.u32 1, %s1005_s20  }
  0x1b   : > { %s1419_s6 = scalar_select %p1128_p13, 1, 0 }
  0x1c   : > { %p690_p0 = pneg %p1128_p13  ;;  %p1137_p4 = pnand %p713_p1, %p1107_p5 }
  0x1d   : > { %p1148_p6 = scmp.ge.s32.totalorder %s37_s11, 2  ;;  %s1423_s3 = sld [smem:[#allocation21_spill]] }
  0x1e   : > { %s1420_s9 = scalar_select %p1137_p4, 1, 0 }
  0x1f   : > { %p1143_p2 = pnand %p690_p0, %p1395_p3 }
  0x20   : > { %s1422_s12 = scalar_select %p1148_p6, 1, 0 }
  0x21   : > { %s1421_s10 = scalar_select %p1143_p2, 1, 0 }
  0x22   : > { %p1403_p10 = pneg %p1143_p2 }
  0x23   : > { %s781_s16 = scalar_lea.hbm %s1423_s3, 64 }
  0x24   : > { %p782_p5 = scmp.ne.s32.totalorder %s1423_s3, %s781_s16  ;;  %p788_p0 = scmp.lt.u32.totalorder %s781_s16, %s1423_s3 }
  0x26   : > { %p784_p11 = pnand %p1403_p10, %p782_p5 }
  0x28   : > { %p785_p1 = pneg %p784_p11 }
  0x2a   : > { %p790_p12 = pnand %p788_p0, %p785_p1 }
  0x2c   : > { %793 = shalt.err (!%p790_p12)
}
  0x2d   : > { %s794_s26 = scalar_lea.vmem %s208_s8, 64  ;;  %p802_p7 = scmp.lt.s32.totalorder %s208_s8, %s208_s8 }
  0x2e   : > { %p795_p3 = scmp.ne.s32.totalorder %s208_s8, %s794_s26  ;;  %p803_p13 = scmp.lt.s32.totalorder %s794_s26, %s794_s26 }
  0x30   : > { %p797_p9 = pnand %p795_p3, %p1403_p10  ;;  %p804_p4 = por %p803_p13, %p802_p7 }
  0x32   : > { %p798_p8 = pneg %p797_p9 }
  0x34   : > { %p805_p6 = pnand %p804_p4, %p798_p8 }
  0x36   : > { %808 = shalt.err (!%p805_p6)
}
  0x37   : > { %693 = dma.hbm_to_vmem [thread:$0]  (!%p1143_p2), %s1423_s3, 64, %s208_s8, [#allocation9]  }
  0x38   : > { %p1424_p3 = scmp.ne.s32.totalorder %s1422_s12, 0  ;;  %s252_s26 = sand.u32 1, %s1017_s23  }
  0x39   : > { %s643_s16 = sshll.u32 %s1153_s13, 4  ;;  %s664_s25 = sshll.u32 %s1013_s22, 8 }
  0x3a   : > { %s1455_s11 = smov (%p1424_p3, %s37_s11), 0  ;;  %s256_s27 = scalar_lea.vmem [#allocation5], %s643_s16 }
  0x3b   : > { %1425 = sst [smem:[#allocation18_spill]] %s1455_s11  ;;  %s41_s17 = ssub.s32 %s1013_s22, %s1455_s11 }
  0x3c   : > { %p44_p7 = scmp.eq.s32.totalorder %s41_s17, 0  ;;  %s265_s7 = sshll.u32 %s256_s27, 4  ;;  %s1196_s7 = int_to_ptr.vmem [resolvable:$true] %s265_s7 }
  0x3d   : > { %s1426_s14 = sadd.s32 1, %s1005_s20  ;;  %s1428_s1 = sld [smem:[#allocation20_spill]] }
  0x3e   : > { %s1189_s15 = scalar_select %p44_p7, %s1005_s20, %s1426_s14  }
  0x3f   : > { %s1198_s8 = scalar_lea.sflag [#allocation6], %s252_s26  ;;  %p1429_p9 = scmp.ne.s32.totalorder %s1420_s9, 0 }
  0x40   : > { %1427 = sst [smem:[#allocation19_spill]] %s1189_s15 }
  0x41   : > { %p1204_p12 = pneg %p1429_p9 }
  0x43   : > { %s1194_s5 = scalar_lea.hbm %s1428_s1, %s664_s25  ;;  %s814_s17 = scalar_lea.hbm %s1428_s1, 512 }
  0x44   : > { %s809_s12 = scalar_lea.hbm %s1194_s5, 256  ;;  %p815_p6 = scmp.lt.u32.totalorder %s1194_s5, %s1428_s1 }
  0x45   : > { %p810_p8 = scmp.ne.s32.totalorder %s1194_s5, %s809_s12  ;;  %p816_p5 = scmp.lt.u32.totalorder %s814_s17, %s809_s12 }
  0x46   : > { %s1430_s16 = scalar_select %p1204_p12, 1, 0 }
  0x47   : > { %p812_p13 = pnand %p1204_p12, %p810_p8  ;;  %p817_p11 = por %p816_p5, %p815_p6 }
  0x48   : > { %p818_p1 = scmp.lt.u32.totalorder %s809_s12, %s1194_s5 }
  0x49   : > { %p813_p4 = pneg %p812_p13 }
  0x4a   : > { %p819_p0 = por %p818_p1, %p817_p11 }
  0x4c   : > { %p820_p3 = pnand %p819_p0, %p813_p4 }
  0x4e   : > { %823 = shalt.err (!%p820_p3)
}
  0x4f   : > { %s824_s26 = scalar_lea.vmem %s1196_s7, 256  ;;  %s1020_s14 = smov [#allocation5]  }
  0x50   : > { %p825_p7 = scmp.ne.s32.totalorder %s1196_s7, %s824_s26  ;;  %s829_s18 = sshll.u32 %s1020_s14, 4  ;;  %s830_s18 = int_to_ptr.vmem [resolvable:$false] %s829_s18 }
  0x51   : > { %s831_s30 = scalar_lea.vmem %s830_s18, 512  ;;  %p832_p10 = scmp.lt.s32.totalorder %s1196_s7, %s830_s18 }
  0x52   : > { %p827_p8 = pnand %p825_p7, %p1204_p12  ;;  %p833_p2 = scmp.lt.s32.totalorder %s831_s30, %s824_s26 }
  0x54   : > { %p828_p13 = pneg %p827_p8  ;;  %p834_p6 = por %p833_p2, %p832_p10 }
  0x56   : > { %p835_p5 = pnand %p834_p6, %p828_p13 }
  0x58   : > { %838 = shalt.err (!%p835_p5)
}
  0x59   : > { %s1021_s12 = smov 128   ;;  %s1022_s17 = smov 8  }
  0x5a   : > { %703 = dma.hbm_to_vmem [thread:$0]  (!%p1429_p9), %s1194_s5, 256, %s1196_s7, %s1198_s8, %s1021_s12, %s1021_s12, %s1022_s17  }
  0x5b   : > { %s1023_s25 = smov [#allocation10]   ;;  %s640_s14 = sshll.u32 %s1153_s13, 3 }
  0x5c   : > { %s218_s27 = sshll.u32 %s1023_s25, 4  ;;  %s839_s26 = scalar_lea.hbm %s1393_s4, 32  ;;  %s219_s27 = int_to_ptr.vmem [resolvable:$true] %s218_s27 }
  0x5d   : > { %p840_p2 = scmp.ne.s32.totalorder %s1393_s4, %s839_s26  ;;  %p1431_p10 = scmp.ne.s32.totalorder %s1421_s10, 0 }
  0x5e   : > { %p846_p0 = scmp.lt.u32.totalorder %s839_s26, %s1393_s4 }
  0x5f   : > { %p1432_p4 = pneg %p1431_p10 }
  0x61   : > { %p842_p11 = pnand %p840_p2, %p1432_p4 }
  0x63   : > { %p843_p1 = pneg %p842_p11 }
  0x65   : > { %p848_p3 = pnand %p846_p0, %p843_p1 }
  0x67   : > { %851 = shalt.err (!%p848_p3)
}
  0x68   : > { %s852_s5 = scalar_lea.vmem %s219_s27, 32  ;;  %p1433_p8 = pmov %p1432_p4 }
  0x69   : > { %p853_p7 = scmp.ne.s32.totalorder %s219_s27, %s852_s5  ;;  %p860_p5 = scmp.lt.s32.totalorder %s219_s27, %s219_s27 }
  0x6a   : > { %p861_p9 = scmp.lt.s32.totalorder %s852_s5, %s852_s5 }
  0x6b   : > { %p855_p13 = pnand %p853_p7, %p1433_p8 }
  0x6c   : > { %p862_p12 = por %p861_p9, %p860_p5 }
  0x6d   : > { %p856_p6 = pneg %p855_p13 }
  0x6f   : > { %p863_p2 = pnand %p862_p12, %p856_p6 }
  0x71   : > { %866 = shalt.err (!%p863_p2)
}
  0x72   : > { %696 = dma.hbm_to_vmem [thread:$0]  (!%p1431_p10), %s1393_s4, 32, %s219_s27, [#allocation9]  }
  0x73   : > { %s663_s11 = sshll.u32 %s1013_s22, 7  ;;  %s233_s7 = scalar_lea.vmem [#allocation2], %s640_s14 }
  0x74   : > { %s242_s15 = sshll.u32 %s233_s7, 4  ;;  %s1253_s25 = scalar_lea.hbm %s1389_s0, %s663_s11  ;;  %s1255_s15 = int_to_ptr.vmem [resolvable:$true] %s242_s15 }
  0x75   : > { %s230_s10 = scalar_lea.sflag [#allocation3], %s1153_s13  ;;  %s867_s18 = scalar_lea.hbm %s1253_s25, 128 }
  0x76   : > { %p868_p9 = scmp.ne.s32.totalorder %s1253_s25, %s867_s18  ;;  %p1434_p12 = scmp.ne.s32.totalorder %s1430_s16, 0 }
  0x77   : > { %s872_s26 = scalar_lea.hbm %s1389_s0, 256  ;;  %p873_p11 = scmp.lt.u32.totalorder %s1253_s25, %s1389_s0 }
  0x78   : > { %p870_p4 = pnand %p868_p9, %p1434_p12  ;;  %p874_p1 = scmp.lt.u32.totalorder %s872_s26, %s867_s18 }
  0x79   : > { %p876_p3 = scmp.lt.u32.totalorder %s867_s18, %s1253_s25 }
  0x7a   : > { %p871_p10 = pneg %p870_p4  ;;  %p875_p0 = por %p874_p1, %p873_p11 }
  0x7c   : > { %p877_p7 = por %p876_p3, %p875_p0 }
  0x7e   : > { %p878_p8 = pnand %p877_p7, %p871_p10 }
  0x80   : > { %881 = shalt.err (!%p878_p8)
}
  0x81   : > { %s882_s1 = scalar_lea.vmem %s1255_s15, 128  ;;  %s1024_s3 = smov [#allocation2]  }
  0x82   : > { %p883_p13 = scmp.ne.s32.totalorder %s1255_s15, %s882_s1  ;;  %s887_s11 = sshll.u32 %s1024_s3, 4  ;;  %s888_s11 = int_to_ptr.vmem [resolvable:$false] %s887_s11 }
  0x83   : > { %s889_s7 = scalar_lea.vmem %s888_s11, 256  ;;  %p890_p2 = scmp.lt.s32.totalorder %s1255_s15, %s888_s11 }
  0x84   : > { %p885_p6 = pnand %p883_p13, %p1434_p12  ;;  %p891_p9 = scmp.lt.s32.totalorder %s889_s7, %s882_s1 }
  0x86   : > { %p886_p5 = pneg %p885_p6  ;;  %p892_p4 = por %p891_p9, %p890_p2 }
  0x88   : > { %p893_p11 = pnand %p892_p4, %p886_p5 }
  0x8a   : > { %896 = shalt.err (!%p893_p11)
}
  0x8b   : > { %s1025_s12 = smov 64   ;;  %s1026_s17 = smov 4  }
  0x8c   : > { %p1435_p10 = scmp.ne.s32.totalorder %s1420_s9, 0  ;;  %s646_s18 = sshll.u32 %s1013_s22, 4 }
  0x8d   : > { %s1285_s26 = scalar_lea.hbm %s1391_s2, %s646_s18  ;;  %s278_s30 = scalar_lea.vmem [#allocation7], %s1153_s13 }
  0x8e   : > { %700 = dma.hbm_to_vmem [thread:$0]  (!%p1435_p10), %s1253_s25, 128, %s1255_s15, %s230_s10, %s1025_s12, %s1025_s12, %s1026_s17  }
  0x8f   : > { %s285_s5 = sshll.u32 %s278_s30, 4  ;;  %s897_s1 = scalar_lea.hbm %s1285_s26, 16  ;;  %s286_s5 = int_to_ptr.vmem [resolvable:$true] %s285_s5 }
  0x90   : > { %p898_p1 = scmp.ne.s32.totalorder %s1285_s26, %s897_s1  ;;  %s902_s25 = scalar_lea.hbm %s1391_s2, 32 }
  0x91   : > { %p903_p7 = scmp.lt.u32.totalorder %s1285_s26, %s1391_s2  ;;  %p904_p8 = scmp.lt.u32.totalorder %s902_s25, %s897_s1 }
  0x92   : > { %p900_p0 = pnand %p898_p1, %p1434_p12  ;;  %p906_p6 = scmp.lt.u32.totalorder %s897_s1, %s1285_s26 }
  0x93   : > { %p905_p13 = por %p904_p8, %p903_p7 }
  0x94   : > { %p901_p3 = pneg %p900_p0 }
  0x95   : > { %p907_p5 = por %p906_p6, %p905_p13 }
  0x97   : > { %p908_p2 = pnand %p907_p5, %p901_p3 }
  0x99   : > { %911 = shalt.err (!%p908_p2)
}
  0x9a   : > { %s912_s13 = scalar_lea.vmem %s286_s5, 16  ;;  %s1027_s7 = smov [#allocation7]  }
  0x9b   : > { %p913_p9 = scmp.ne.s32.totalorder %s286_s5, %s912_s13  ;;  %s917_s12 = sshll.u32 %s1027_s7, 4  ;;  %s918_s12 = int_to_ptr.vmem [resolvable:$false] %s917_s12 }
  0x9c   : > { %s919_s17 = scalar_lea.vmem %s918_s12, 32  ;;  %p920_p1 = scmp.lt.s32.totalorder %s286_s5, %s918_s12 }
  0x9d   : > { %p915_p4 = pnand %p913_p9, %p1434_p12  ;;  %p921_p0 = scmp.lt.s32.totalorder %s919_s17, %s912_s13 }
  0x9f   : > { %p916_p11 = pneg %p915_p4  ;;  %p922_p10 = por %p921_p0, %p920_p1 }
  0xa1   : > { %p923_p7 = pnand %p922_p10, %p916_p11 }
  0xa3   : > { %926 = shalt.err (!%p923_p7)
}
  0xa4   : > { %p1436_p8 = scmp.ne.s32.totalorder %s1420_s9, 0  ;;  %p1437_p3 = scmp.ne.s32.totalorder %s1419_s6, 0 }
  0xa5   : > { %s1309_s16 = sand.u32 (!%p1437_p3), 1, %s1001_s19   ;;  %p1438_p12 = scmp.ne.s32.totalorder (!%p1437_p3), %s1415_s28, 0 }
  0xa6   : > { %706 = dma.hbm_to_vmem [thread:$0]  (!%p1436_p8), %s1285_s26, 16, %s286_s5, %s1198_s8  }
  0xa7   : > { %294 = sbr.rel (%p1437_p3) target bundleno = 422 (0x1a6), region = 40  ;;  %s648_s18 = sshll.u32 (!%p1437_p3), %s1309_s16, 3 }
  0xa8   : > { %s297_s27 = scalar_lea.sflag (!%p1437_p3), [#allocation3], %s1309_s16  ;;  %s300_s14 = scalar_lea.vmem (!%p1437_p3), [#allocation2], %s648_s18 }
  0xae   : > { %980 = dma.done.wait (%p1438_p12), %s297_s27, 128  }
  0xaf   : > { %982 = vsyncadd (%p1438_p12), %s297_s27, 4294967168  ;;  %s305_s6 = sand.u32 1, %s1096_s24   ;;  %s649_s9 = sshll.u32 %s1309_s16, 4 }
  0xb0   : > { %s306_s8 = scalar_lea.sflag [#allocation6], %s305_s6  ;;  %s309_s26 = scalar_lea.vmem [#allocation5], %s649_s9 }
  0xb1   : > { %984 = dma.done.wait (%p1438_p12), %s306_s8, 272  }
  0xb2   : > { %986 = vsyncadd (%p1438_p12), %s306_s8, 4294967024  ;;  %s317_s30 = scalar_lea.vmem [#allocation7], %s1309_s16  ;;  %p1439_p10 = scmp.eq.s32.totalorder %s1096_s24, 0 }
  0xb4   : > { %988 = dma.done.wait (%p1439_p10), [#allocation9], 96   ;;  %p1440_p13 = pmov %p1439_p10 }
  0xb5   : > { %v1028_v0 = vmov 0.0   ;;  %vm1029_vm0 = vmmov 0   ;;  %v1030_v1 = vmov 0   ;;  %v1031_v2 = vmov 1   ;;  %v367_v3 = vld [vmem:[#allocation8] sm:$0xf] }
  0xb6   : > { %990 = vsyncadd (%p1440_p13), [#allocation9], 4294967200  ;;  %668 = vmatprep.subr.bf16.mxu0 %v1028_v0  ;;  %670 = vmatprep.mubr.msk.bf16.mxu0 %vm1029_vm0, %v1028_v0  ;;  %vm396_vm1 = vcmask 1043456   ;;  %v780_v5 = vld [vmem:[%s300_s14] sm:$0xff]   ;;  %v368_v6 = vld [vmem:[%s309_s26] sm:$0xff]  ;;  %vm392_vm2 = vcmask 64512  }
  0xb7   : > { %777 = vset.pattern.permute.xlu0 %v1030_v1  ;;  %778 = vset.pattern.permute.xlu1 %v1031_v2  ;;  %v398_v4 = vsel %vm396_vm1, %v367_v3, 0  ;;  %v369_v7 = vld [vmem:[%s309_s26 + $0x8] sm:$0xff]  ;;  %v653_v10 = vld [vmem:[#allocation10] ss:$0 sm:$0xff]  ;;  %v656_v11 = vld [vmem:[#allocation10 + $0x1] ss:$0 sm:$0xff] }
  0xb8   : > { %669 = vmatpush3.bf16.msra.mxu0 %v398_v4  ;;  %373 = vperm.xlu0 %777, %v368_v6   ;;  %v657_v20 = vld [vmem:[%s317_s30] ss:$0 sm:$0xff]  ;;  %s360_s24 = scalar_lea.vmem [#allocation11], %s649_s9  ;;  %s665_s5 = sshll.u32 %s1009_s21, 8 }
  0xb9   : > { %443 = vperm.xlu1 %778, %v368_v6   ;;  %s485_s28 = sshll.u32 %s360_s24, 4  ;;  %s1441_s15 = sld [smem:[#allocation22_spill]]  ;;  %s1335_s28 = int_to_ptr.vmem [resolvable:$true] %s485_s28 }
  0xba   : > { %s470_s10 = scalar_lea.sflag [#allocation4], %s1309_s16  ;;  %s927_s11 = scalar_lea.vmem %s1335_s28, 256 }
  0xbb   : > { %671 = vmatmul.mubr.msk.bf16.vlgmr.msra.gmra.mrb[0].mxu0 %vm392_vm2, %v780_v5  ;;  %p928_p6 = scmp.ne.s32.totalorder %s1335_s28, %s927_s11  ;;  %p1442_p5 = scmp.ne.s32.totalorder %s1416_s29, 0 }
  0xbc   : > { %378 = vperm.xlu0 %777, %v369_v7   ;;  %s1032_s21 = smov [#allocation11]  }
  0xbd   : > { %447 = vperm.xlu1 %778, %v369_v7   ;;  %p929_p2 = pnand %p928_p6, %p1442_p5  ;;  %s931_s13 = sshll.u32 %s1032_s21, 4  ;;  %s932_s13 = int_to_ptr.vmem [resolvable:$false] %s931_s13 }
  0xbe   : > { %s933_s7 = scalar_lea.vmem %s932_s13, 512  ;;  %p934_p4 = scmp.lt.s32.totalorder %s1335_s28, %s932_s13 }
  0xbf   : > { %s1340_s25 = scalar_lea.hbm %s1441_s15, %s665_s5  ;;  %p930_p9 = pneg %p929_p2 }
  0xc0   : > { %779 = vset.pattern.permute.xlu0 %v1031_v2  ;;  %p935_p11 = scmp.lt.s32.totalorder %s933_s7, %s927_s11 }
  0xc2   : > { %p936_p1 = por %p935_p11, %p934_p4 }
  0xc4   : > { %p937_p0 = pnand %p936_p1, %p930_p9 }
 0x137   : > { %v374_v8 = vpop.permute.xlu0 %373 }
 0x138   : > { %v444_v9 = vpop.permute.xlu1 %443  ;;  %v385_v13 = vmul.f32 %v653_v10, %v374_v8 }
 0x139   : > { %v454_v16 = vmul.f32 %v656_v11, %v444_v9 }
 0x13b   : > { %v379_v12 = vpop.permute.xlu0 %378 }
 0x13c   : > { %v448_v14 = vpop.permute.xlu1 %447  ;;  %v386_v17 = vmul.f32 %v653_v10, %v379_v12 }
 0x13d   : > { %v455_v22 = vmul.f32 %v656_v11, %v448_v14 }
 0x18e   : > { %v434_v15 = vpop.f32.mrb[0].mxu0 }
 0x18f   : > { %v435_v18 = vadd.f32 %v434_v15, %v385_v13  ;;  %v672_v19 = vpop.f32.mrb[1].mxu0 }
 0x190   : > { %v437_v21 = vpop.f32.mrb[2].mxu0 }
 0x191   : > { %v456_v23 = vadd.f32 %v454_v16, %v435_v18  ;;  %v438_v24 = vadd.f32 %v437_v21, %v386_v17  ;;  %v673_v25 = vpop.f32.mrb[3].mxu0 }
 0x193   : > { %v465_v26 = vadd.f32 %v657_v20, %v456_v23  ;;  %v457_v27 = vadd.f32 %v455_v22, %v438_v24 }
 0x195   : > { %467 = vst [vmem:[%s360_s24] sm:$0xff] %v465_v26  ;;  %v466_v28 = vadd.f32 %v657_v20, %v457_v27 }
 0x197   : > { %468 = vst [vmem:[%s360_s24 + $0x8] sm:$0xff] %v466_v28 }
 0x198   : > { %940 = shalt.err (!%p937_p0)
}
 0x199   : > { %s941_s12 = scalar_lea.hbm %s1340_s25, 256  ;;  %s945_s27 = scalar_lea.hbm %s1441_s15, 512 }
 0x19a   : > { %p942_p7 = scmp.ne.s32.totalorder %s1340_s25, %s941_s12  ;;  %p946_p12 = scmp.lt.u32.totalorder %s1340_s25, %s1441_s15 }
 0x19b   : > { %p947_p10 = scmp.lt.u32.totalorder %s945_s27, %s941_s12  ;;  %p949_p6 = scmp.lt.u32.totalorder %s941_s12, %s1340_s25 }
 0x19c   : > { %p943_p8 = pnand %p942_p7, %p1442_p5 }
 0x19d   : > { %p948_p13 = por %p947_p10, %p946_p12 }
 0x19e   : > { %p944_p3 = pneg %p943_p8 }
 0x19f   : > { %p950_p2 = por %p949_p6, %p948_p13 }
 0x1a1   : > { %p951_p9 = pnand %p950_p2, %p944_p3 }
 0x1a3   : > { %954 = shalt.err (!%p951_p9)
}
 0x1a4   : > { %s1033_s9 = smov 128   ;;  %s1034_s8 = smov 8  }
 0x1a5   : > { %688 = dma.vmem_to_hbm [thread:$0]  (%p1442_p5), %s1335_s28, 256, %s1340_s25, %s470_s10, %s1033_s9, %s1033_s9, %s1034_s8  }
 0x1a6 PF: > { %s1443_s26 = sld [smem:[#allocation16_spill]]  ;;  %s1444_s30 = sld [smem:[#allocation17_spill]] }
 0x1a7   : > { %p1446_p11 = scmp.ge.s32.totalorder %s1017_s23, 2 }
 0x1ac   : > { %s500_s24 = sand.u32 1, %s1443_s26   ;;  %p1445_p4 = scmp.ne.s32.totalorder %s1444_s30, 0 }
 0x1ad   : > { %s501_s5 = scalar_lea.sflag [#allocation4], %s500_s24 }
 0x1ae   : > { %p708_p1 = pnand %p1446_p11, %p1445_p4 }
 0x1b0   : > { %992 = dma.done.wait (!%p708_p1), %s501_s5, 256  }
 0x1b1   : > { %994 = vsyncadd (!%p708_p1), %s501_s5, 4294967040  ;;  %s25_s23 = sadd.s32 1, %s1017_s23   ;;  %s1447_s1 = sld [smem:[#allocation19_spill]] }
 0x1b2   : > { %p22_p0 = scmp.ge.s32.totalorder %s25_s23, 4   ;;  %s1448_s29 = sld [smem:[#allocation18_spill]] }
 0x1b3   : > { %s1449_s18 = smov %s1001_s19  ;;  %s1450_s19 = smov %s1005_s20 }
 0x1b4   : > { %s1452_s21 = smov %s1013_s22  ;;  %24 = sbr.rel (!%p22_p0) target bundleno = 13 (0xd), region = 117 }
 0x1b7   : > { %s1451_s20 = smov %s1447_s1 }
 0x1b8   : > { %s1453_s22 = smov %s1448_s29 }
 0x1bb   :  { %506 = vsyncpa [#allocation3], 1 }
 0x1bc   :  { %508 = vsyncpa [#allocation3 + $0x1], 1 }
 0x1bd   :  { %509 = vsyncpa [#allocation6], 1 }
 0x1be   :  { %511 = vsyncpa [#allocation6 + $0x1], 1 }
 0x1bf   :  { %512 = vsyncpa [#allocation9], 1 }
 0x1c0   :  { %513 = vsyncpa [#allocation4], 1 }
 0x1c1   :  { %515 = vsyncpa [#allocation4 + $0x1], 1 }

</bundles_post_ra>
